<compile_context>
chip_gen: v6e
topology: v6e:2x2x1
jax: 0.10.0
libtpu: 0.0.40
codegen_flags: <defaults>
</compile_context>

<pallas_src>
import functools

import jax
import jax.numpy as jnp
from jax.experimental import pallas as pl
from jax.experimental.pallas import tpu as pltpu


# ------------------------------ Pallas kernel ------------------------------ #

def _graph_mean_agg_kernel(xs_ref, adj_ref, o_ref, *, sep):
    """One dst-node row tile per grid step.

    xs_ref : (N, F)        all source-node features (resident every step)
    adj_ref: (E, TN, N)    row-normalized adjacency rows of this dst tile
    o_ref  : (TN, (sep + E) * F)
    """
    E, TN, N = adj_ref.shape
    F = xs_ref.shape[1]

    xs = xs_ref[...]                                         # (N, F)

    base = 0
    if sep:
        # sep passthrough: this dst tile's own features, taken from the resident x
        # (no second DMA'd copy of x).
        if TN == N:
            xt = xs
        else:
            start = pl.multiple_of(pl.program_id(0) * TN, 8)
            xt = xs_ref[pl.ds(start, TN), :]
        o_ref[:, 0:F] = xt.astype(o_ref.dtype)               # lane-dense store (F % 128 == 0)
        base = 1

    # Fused mean aggregation over ALL edge types in one MXU call:
    #   (E*TN, N) @ (N, F) -> (E*TN, F).  Leading-dim collapse is layout-preserving.
    agg = jnp.dot(adj_ref[...].reshape(E * TN, N), xs,
                  preferred_element_type=jnp.float32)

    # Direct per-etype slice stores (sublane-only row slices, 128-lane-aligned columns)
    # instead of materializing a wide concat intermediate.
    for e in range(E):                                        # E small & static -> unrolled
        o_ref[:, (base + e) * F:(base + e + 1) * F] = (
            agg[e * TN:(e + 1) * TN, :].astype(o_ref.dtype))


# -------------------------------- wrapper ----------------------------------- #

def graph_mean_aggregation(x, adj_norm, *, sep=True, row_tile=None):
    """out = concat([x] (if sep) + [adj_norm[e] @ x for e], axis=-1), shape (N, (sep+E)*F)."""
    N, F = x.shape
    E = adj_norm.shape[0]
    out_dim = ((1 if sep else 0) + E) * F

    if row_tile is None:
        # Single tile by default (1-TC v5e/v6e, and any launch-overhead-bound size).
        # Only split 2-way (for v7x's second TensorCore) when each half-tile's output
        # is big enough (~>=256 KiB) to amortize the per-core pipeline setup.
        row_tile = N
        if N % 2 == 0 and (N // 2) % 8 == 0:
            half_out_bytes = (N // 2) * out_dim * 4
            if half_out_bytes >= (256 << 10):
                row_tile = N // 2
    assert N % row_tile == 0 and row_tile % 8 == 0
    # Lane-dense output stores rely on F being a multiple of 128 (true here: F == 128).
    assert F % 128 == 0, "feature dim must be a multiple of 128 for lane-dense stores"

    kernel = functools.partial(_graph_mean_agg_kernel, sep=sep)
    return pl.pallas_call(
        kernel,
        out_shape=jax.ShapeDtypeStruct((N, out_dim), jnp.float32),
        grid=(N // row_tile,),
        in_specs=[
            pl.BlockSpec((N, F), lambda i: (0, 0)),              # full x, resident every step
            pl.BlockSpec((E, row_tile, N), lambda i: (0, i, 0)),  # adjacency rows, all etypes
        ],
        out_specs=pl.BlockSpec((row_tile, out_dim), lambda i: (i, 0)),
        compiler_params=pltpu.CompilerParams(dimension_semantics=("parallel",)),
    )(x, adj_norm)


# ------------------------- glue / reference / test -------------------------- #

def build_normalized_adjacency(key, n, num_etypes, p=0.05):
    """Dense row-normalized adjacency per edge type (copy_u_mean operator)."""
    # TODO(synk): a real DGL heterograph stores sparse per-etype edge lists; here the
    #             per-edge-type subgraphs are lowered to dense normalized adjacencies.
    #             For large sparse graphs, add a K grid axis + accumulator and
    #             scalar-prefetched block-occupancy to skip all-zero adjacency tiles.
    keys = jax.random.split(key, num_etypes)
    adjs = []
    for e in range(num_etypes):
        a = jax.random.bernoulli(keys[e], p, (n, n)).astype(jnp.float32)
        deg = a.sum(axis=1, keepdims=True)                  # in-degree per dst node
        adjs.append(a / jnp.maximum(deg, 1.0))              # zero rows stay zero (DGL mean)
    return jnp.stack(adjs, axis=0)


def reference_forward(x, adj_norm, sep=True):
    """Pure-JAX reference with identical semantics."""
    parts = [x] if sep else []
    for e in range(adj_norm.shape[0]):
        parts.append(adj_norm[e] @ x)
    return jnp.concatenate(parts, axis=-1)


if __name__ == "__main__":
    # small shapes: num_nodes=128, feature_dim=128, num_edge_types=2, sep=True
    N, F, E = 128, 128, 2
    key = jax.random.PRNGKey(0)
    k_x, k_g = jax.random.split(key)

    x = jax.random.normal(k_x, (N, F), jnp.float32)
    adj_norm = build_normalized_adjacency(k_g, N, E)

    out = graph_mean_aggregation(x, adj_norm, sep=True)
    out = jax.block_until_ready(out)

    ref = reference_forward(x, adj_norm, sep=True)
    assert out.shape == (N, (1 + E) * F), out.shape
    assert jnp.allclose(out, ref, rtol=1e-4, atol=1e-4), "kernel/reference mismatch"

    print("KERNEL_OK")
</pallas_src>

<mosaic_0001>
module attributes {stable_mosaic.version = 11 : i64} {
  func.func @_graph_mean_agg_kernel(%arg0: i32, %arg1: memref<128x128xf32, #tpu.memory_space<vmem>>, %arg2: memref<2x128x128xf32, #tpu.memory_space<vmem>>, %arg3: memref<128x384xf32, #tpu.memory_space<vmem>>) attributes {dimension_semantics = [#tpu.dimension_semantics<parallel>], iteration_bounds = array<i64: 1>, scalar_prefetch = 0 : i64, scratch_operands = 0 : i64, tpu.core_type = #tpu.core_type<tc>, window_params = [{pipeline_mode = #tpu.pipeline_mode<synchronous>, transform_indices = @transform_0, window_bounds = array<i64: 128, 128>}, {transform_indices = @transform_1, window_bounds = array<i64: 2, 128, 128>}, {transform_indices = @transform_2, window_bounds = array<i64: 128, 384>}]} {
    %c0 = arith.constant 0 : index
    %c0_0 = arith.constant 0 : index
    %0 = vector.load %arg1[%c0, %c0_0] : memref<128x128xf32, #tpu.memory_space<vmem>>, vector<128x128xf32>
    %c0_1 = arith.constant 0 : index
    %c0_2 = arith.constant 0 : index
    %1 = vector.load %arg3[%c0_1, %c0_2] : memref<128x384xf32, #tpu.memory_space<vmem>>, vector<128x128xf32>
    tpu.vector_store %arg3[%c0_1, %c0_2], %0 {strides = array<i32>} : memref<128x384xf32, #tpu.memory_space<vmem>>, vector<128x128xf32>,
    %c0_3 = arith.constant 0 : index
    %c0_4 = arith.constant 0 : index
    %c0_5 = arith.constant 0 : index
    %2 = vector.load %arg2[%c0_3, %c0_4, %c0_5] : memref<2x128x128xf32, #tpu.memory_space<vmem>>, vector<2x128x128xf32>
    %3 = vector.shape_cast %2 : vector<2x128x128xf32> to vector<256x128xf32>
    %cst = arith.constant dense<0.000000e+00> : vector<256x128xf32>
    %4 = tpu.matmul %3, %0, %cst {dimension_numbers = #tpu.dot_dimension_numbers<[1], [0], [0], [1], [0, 0, 1, 1], [], []>} : vector<256x128xf32>, vector<128x128xf32>, vector<256x128xf32> -> vector<256x128xf32>
    %5 = vector.extract_strided_slice %4 {offsets = [0, 0], sizes = [128, 128], strides = [1, 1]} : vector<256x128xf32> to vector<128x128xf32>
    %c0_6 = arith.constant 0 : index
    %c128 = arith.constant 128 : index
    %6 = vector.load %arg3[%c0_6, %c128] : memref<128x384xf32, #tpu.memory_space<vmem>>, vector<128x128xf32>
    tpu.vector_store %arg3[%c0_6, %c128], %5 {strides = array<i32>} : memref<128x384xf32, #tpu.memory_space<vmem>>, vector<128x128xf32>,
    %7 = vector.extract_strided_slice %4 {offsets = [128, 0], sizes = [128, 128], strides = [1, 1]} : vector<256x128xf32> to vector<128x128xf32>
    %c0_7 = arith.constant 0 : index
    %c256 = arith.constant 256 : index
    %8 = vector.load %arg3[%c0_7, %c256] : memref<128x384xf32, #tpu.memory_space<vmem>>, vector<128x128xf32>
    tpu.vector_store %arg3[%c0_7, %c256], %7 {strides = array<i32>} : memref<128x384xf32, #tpu.memory_space<vmem>>, vector<128x128xf32>,
    return
  }
  func.func @transform_0(%arg0: i32) -> (i32, i32) {
    %c0_i32 = arith.constant 0 : i32
    %c0_i32_0 = arith.constant 0 : i32
    %c0_i32_1 = arith.constant 0 : i32
    return %c0_i32, %c0_i32_0 : i32, i32
  }
  func.func @transform_1(%arg0: i32) -> (i32, i32, i32) {
    %c0_i32 = arith.constant 0 : i32
    %c0_i32_0 = arith.constant 0 : i32
    %c0_i32_1 = arith.constant 0 : i32
    return %c0_i32, %arg0, %c0_i32_0 : i32, i32, i32
  }
  func.func @transform_2(%arg0: i32) -> (i32, i32) {
    %c0_i32 = arith.constant 0 : i32
    %c0_i32_0 = arith.constant 0 : i32
    return %arg0, %c0_i32 : i32, i32
  }
}

</mosaic_0001>

<bundles_post_ra>
// kernel: tpu_custom_call.1
= control target key start
LH: loop header
LB: loop body
LE: loop exit
PB: predicated region body
PF: predicated region fallthrough
CT: control target
= control target key end

     0   :  { %7 = vsyncpa [#allocation3], 0  ;;  %s643_s0 = inlined_call_operand.hbm [shape: f32[128,128], index: 0, kind: input, shape index: {}]   ;;  %s644_s1 = inlined_call_operand.hbm [shape: f32[2,128,128], index: 1, kind: input, shape index: {}]   ;;  %s645_s2 = inlined_call_operand.hbm [shape: f32[128,384], index: 2, kind: output, shape index: {}]  }
   0x1   :  { %8 = vsyncpa [#allocation6], 0 }
   0x2   :  { %9 = vsyncpa [#allocation4], 0  ;;  %s612_s9 = smov [#allocation2]  }
   0x3   :  { %s15_s10 = sshll.u32 %s612_s9, 4  ;;  %s16_s10 = int_to_ptr.vmem [resolvable:$true] %s15_s10 }
   0x4   :  { %s554_s11 = scalar_lea.vmem %s16_s10, 2048  ;;  %p559_p1 = scmp.lt.s32.totalorder %s16_s10, %s16_s10 }
   0x5   :  { %p555_p0 = scmp.ne.s32.totalorder %s16_s10, %s554_s11  ;;  %p560_p2 = scmp.lt.s32.totalorder %s554_s11, %s554_s11 }
   0x7   :  { %p561_p3 = por %p560_p2, %p559_p1 }
   0x9   :  { %p562_p4 = pnand %p561_p3, %p555_p0 }
   0xb   :  { %565 = shalt.err (!%p562_p4)
}
   0xc   :  { %s613_s12 = smov 128   ;;  %s614_s13 = smov 8  }
   0xd   :  { %21 = dma.hbm_to_vmem [thread:$0]  %s643_s0, 2048, %s16_s10, [#allocation3], %s613_s12, %s613_s12, %s614_s13  }
   0xe   :  { %s615_s16 = smov [#allocation5]  }
   0xf   :  { %s27_s17 = sshll.u32 %s615_s16, 4  ;;  %s28_s17 = int_to_ptr.vmem [resolvable:$true] %s27_s17 }
  0x10   :  { %s574_s18 = scalar_lea.vmem %s28_s17, 4096  ;;  %p579_p6 = scmp.lt.s32.totalorder %s28_s17, %s28_s17 }
  0x11   :  { %p575_p5 = scmp.ne.s32.totalorder %s28_s17, %s574_s18  ;;  %p580_p7 = scmp.lt.s32.totalorder %s574_s18, %s574_s18 }
  0x13   :  { %p581_p8 = por %p580_p7, %p579_p6 }
  0x15   :  { %p582_p9 = pnand %p581_p8, %p575_p5 }
  0x17   :  { %585 = shalt.err (!%p582_p9)
}
  0x18   :  { %33 = dma.hbm_to_vmem [thread:$0]  %s644_s1, 4096, %s28_s17, [#allocation6], %s613_s12, %s613_s12, %s614_s13  }
  0x19   :  { %606 = dma.done.wait [#allocation3], 2048  }
  0x1a   :  { %607 = vsyncadd [#allocation3], 4294965248 }
  0x1b   :  { %608 = dma.done.wait [#allocation6], 4096  }
  0x1c   :  { %609 = vsyncadd [#allocation6], 4294963200  ;;  %v55_v0 = vld [vmem:[#allocation2 + $0x78] sm:$0xff]  ;;  %v54_v1 = vld [vmem:[#allocation2 + $0x70] sm:$0xff]  ;;  %s616_s0 = smov [#allocation7]  }
  0x1d   :  { %v53_v2 = vld [vmem:[#allocation2 + $0x68] sm:$0xff]  ;;  %71 = vst [vmem:[#allocation7 + $0x168] sm:$0xff] %v55_v0  ;;  %427 = vmatprep.subr.mxu0 %v55_v0  ;;  %507 = vmatprep.subr.mxu1 %v55_v0  ;;  %70 = vst [vmem:[#allocation7 + $0x150] sm:$0xff] %v54_v1  ;;  %v52_v3 = vld [vmem:[#allocation2 + $0x60] sm:$0xff]  ;;  %s366_s1 = sshll.u32 %s616_s0, 4  ;;  %s367_s1 = int_to_ptr.vmem [resolvable:$true] %s366_s1 }
  0x1e   :  { %69 = vst [vmem:[#allocation7 + $0x138] sm:$0xff] %v53_v2  ;;  %v51_v4 = vld [vmem:[#allocation2 + $0x58] sm:$0xff]  ;;  %v50_v5 = vld [vmem:[#allocation2 + $0x50] sm:$0xff]  ;;  %428 = vmatpush3.msra.mxu0 %v55_v0  ;;  %523 = vmatpush3.msra.mxu1 %v55_v0  ;;  %68 = vst [vmem:[#allocation7 + $0x120] sm:$0xff] %v52_v3  ;;  %s586_s21 = scalar_lea.vmem %s367_s1, 6144  ;;  %p591_p11 = scmp.lt.s32.totalorder %s367_s1, %s367_s1 }
  0x1f   :  { %67 = vst [vmem:[#allocation7 + $0x108] sm:$0xff] %v51_v4  ;;  %66 = vst [vmem:[#allocation7 + $0xf0] sm:$0xff] %v50_v5  ;;  %v49_v6 = vld [vmem:[#allocation2 + $0x48] sm:$0xff]  ;;  %v48_v7 = vld [vmem:[#allocation2 + $0x40] sm:$0xff]  ;;  %429 = vmatprep.subr.mxu0 %v54_v1  ;;  %508 = vmatprep.subr.mxu1 %v54_v1  ;;  %p587_p10 = scmp.ne.s32.totalorder %s367_s1, %s586_s21  ;;  %p592_p12 = scmp.lt.s32.totalorder %s586_s21, %s586_s21 }
  0x20   :  { %v47_v8 = vld [vmem:[#allocation2 + $0x38] sm:$0xff]  ;;  %65 = vst [vmem:[#allocation7 + $0xd8] sm:$0xff] %v49_v6  ;;  %64 = vst [vmem:[#allocation7 + $0xc0] sm:$0xff] %v48_v7  ;;  %v46_v9 = vld [vmem:[#allocation2 + $0x30] sm:$0xff]  ;;  %430 = vmatpush3.msra.mxu0 %v54_v1  ;;  %524 = vmatpush3.msra.mxu1 %v54_v1 }
  0x21   :  { %63 = vst [vmem:[#allocation7 + $0xa8] sm:$0xff] %v47_v8  ;;  %v45_v10 = vld [vmem:[#allocation2 + $0x28] sm:$0xff]  ;;  %v44_v11 = vld [vmem:[#allocation2 + $0x20] sm:$0xff]  ;;  %62 = vst [vmem:[#allocation7 + $0x90] sm:$0xff] %v46_v9  ;;  %431 = vmatprep.subr.mxu0 %v53_v2  ;;  %509 = vmatprep.subr.mxu1 %v53_v2  ;;  %p593_p13 = por %p592_p12, %p591_p11 }
  0x22   :  { %61 = vst [vmem:[#allocation7 + $0x78] sm:$0xff] %v45_v10  ;;  %60 = vst [vmem:[#allocation7 + $0x60] sm:$0xff] %v44_v11  ;;  %v43_v12 = vld [vmem:[#allocation2 + $0x18] sm:$0xff]  ;;  %v42_v13 = vld [vmem:[#allocation2 + $0x10] sm:$0xff]  ;;  %432 = vmatpush3.msra.mxu0 %v53_v2  ;;  %525 = vmatpush3.msra.mxu1 %v53_v2 }
  0x23   :  { %v41_v14 = vld [vmem:[#allocation2 + $0x8] sm:$0xff]  ;;  %59 = vst [vmem:[#allocation7 + $0x48] sm:$0xff] %v43_v12  ;;  %58 = vst [vmem:[#allocation7 + $0x30] sm:$0xff] %v42_v13  ;;  %v40_v15 = vld [vmem:[#allocation2] sm:$0xff]  ;;  %433 = vmatprep.subr.mxu0 %v52_v3  ;;  %510 = vmatprep.subr.mxu1 %v52_v3  ;;  %p594_p0 = pnand %p593_p13, %p587_p10 }
  0x24   :  { %57 = vst [vmem:[#allocation7 + $0x18] sm:$0xff] %v41_v14  ;;  %56 = vst [vmem:[#allocation7] sm:$0xff] %v40_v15  ;;  %434 = vmatpush3.msra.mxu0 %v52_v3  ;;  %526 = vmatpush3.msra.mxu1 %v52_v3  ;;  %v72_v16 = vld [vmem:[#allocation5] sm:$0xff]  ;;  %v73_v18 = vld [vmem:[#allocation5 + $0x8] sm:$0xff] }
  0x25   :  { %435 = vmatprep.subr.mxu0 %v51_v4  ;;  %511 = vmatprep.subr.mxu1 %v51_v4  ;;  %v88_v17 = vld [vmem:[#allocation5 + $0x80] sm:$0xff]  ;;  %v89_v19 = vld [vmem:[#allocation5 + $0x88] sm:$0xff]  ;;  %v74_v20 = vld [vmem:[#allocation5 + $0x10] sm:$0xff] }
  0x26   :  { %436 = vmatpush3.msra.mxu0 %v51_v4  ;;  %527 = vmatpush3.msra.mxu1 %v51_v4  ;;  %v90_v21 = vld [vmem:[#allocation5 + $0x90] sm:$0xff]  ;;  %v75_v22 = vld [vmem:[#allocation5 + $0x18] sm:$0xff]  ;;  %v76_v24 = vld [vmem:[#allocation5 + $0x20] sm:$0xff] }
  0x27   :  { %437 = vmatprep.subr.mxu0 %v50_v5  ;;  %512 = vmatprep.subr.mxu1 %v50_v5  ;;  %v91_v23 = vld [vmem:[#allocation5 + $0x98] sm:$0xff]  ;;  %v92_v25 = vld [vmem:[#allocation5 + $0xa0] sm:$0xff]  ;;  %v77_v26 = vld [vmem:[#allocation5 + $0x28] sm:$0xff] }
  0x28   :  { %438 = vmatpush3.msra.mxu0 %v50_v5  ;;  %528 = vmatpush3.msra.mxu1 %v50_v5  ;;  %v93_v27 = vld [vmem:[#allocation5 + $0xa8] sm:$0xff]  ;;  %v78_v28 = vld [vmem:[#allocation5 + $0x30] sm:$0xff]  ;;  %v79_v30 = vld [vmem:[#allocation5 + $0x38] sm:$0xff] }
  0x29   :  { %439 = vmatprep.subr.mxu0 %v49_v6  ;;  %513 = vmatprep.subr.mxu1 %v49_v6  ;;  %v94_v29 = vld [vmem:[#allocation5 + $0xb0] sm:$0xff]  ;;  %v95_v31 = vld [vmem:[#allocation5 + $0xb8] sm:$0xff]  ;;  %v80_v32 = vld [vmem:[#allocation5 + $0x40] sm:$0xff] }
  0x2a   :  { %440 = vmatpush3.msra.mxu0 %v49_v6  ;;  %529 = vmatpush3.msra.mxu1 %v49_v6  ;;  %v96_v33 = vld [vmem:[#allocation5 + $0xc0] sm:$0xff]  ;;  %v81_v34 = vld [vmem:[#allocation5 + $0x48] sm:$0xff]  ;;  %v82_v36 = vld [vmem:[#allocation5 + $0x50] sm:$0xff] }
  0x2b   :  { %441 = vmatprep.subr.mxu0 %v48_v7  ;;  %514 = vmatprep.subr.mxu1 %v48_v7  ;;  %v97_v35 = vld [vmem:[#allocation5 + $0xc8] sm:$0xff]  ;;  %v98_v37 = vld [vmem:[#allocation5 + $0xd0] sm:$0xff]  ;;  %v83_v38 = vld [vmem:[#allocation5 + $0x58] sm:$0xff] }
  0x2c   :  { %442 = vmatpush3.msra.mxu0 %v48_v7  ;;  %530 = vmatpush3.msra.mxu1 %v48_v7  ;;  %v99_v39 = vld [vmem:[#allocation5 + $0xd8] sm:$0xff]  ;;  %v84_v40 = vld [vmem:[#allocation5 + $0x60] sm:$0xff]  ;;  %v85_v42 = vld [vmem:[#allocation5 + $0x68] sm:$0xff] }
  0x2d   :  { %443 = vmatprep.subr.mxu0 %v47_v8  ;;  %515 = vmatprep.subr.mxu1 %v47_v8  ;;  %v100_v41 = vld [vmem:[#allocation5 + $0xe0] sm:$0xff]  ;;  %v101_v43 = vld [vmem:[#allocation5 + $0xe8] sm:$0xff]  ;;  %v86_v44 = vld [vmem:[#allocation5 + $0x70] sm:$0xff] }
  0x2e   :  { %444 = vmatpush3.msra.mxu0 %v47_v8  ;;  %531 = vmatpush3.msra.mxu1 %v47_v8  ;;  %v102_v45 = vld [vmem:[#allocation5 + $0xf0] sm:$0xff]  ;;  %v87_v46 = vld [vmem:[#allocation5 + $0x78] sm:$0xff] }
  0x2f   :  { %445 = vmatprep.subr.mxu0 %v46_v9  ;;  %516 = vmatprep.subr.mxu1 %v46_v9  ;;  %v103_v47 = vld [vmem:[#allocation5 + $0xf8] sm:$0xff] }
  0x30   :  { %446 = vmatpush3.msra.mxu0 %v46_v9  ;;  %532 = vmatpush3.msra.mxu1 %v46_v9 }
  0x31   :  { %447 = vmatprep.subr.mxu0 %v45_v10  ;;  %517 = vmatprep.subr.mxu1 %v45_v10 }
  0x32   :  { %448 = vmatpush3.msra.mxu0 %v45_v10  ;;  %533 = vmatpush3.msra.mxu1 %v45_v10 }
  0x33   :  { %449 = vmatprep.subr.mxu0 %v44_v11  ;;  %518 = vmatprep.subr.mxu1 %v44_v11 }
  0x34   :  { %450 = vmatpush3.msra.mxu0 %v44_v11  ;;  %534 = vmatpush3.msra.mxu1 %v44_v11 }
  0x35   :  { %451 = vmatprep.subr.mxu0 %v43_v12  ;;  %519 = vmatprep.subr.mxu1 %v43_v12 }
  0x36   :  { %452 = vmatpush3.msra.mxu0 %v43_v12  ;;  %535 = vmatpush3.msra.mxu1 %v43_v12 }
  0x37   :  { %453 = vmatprep.subr.mxu0 %v42_v13  ;;  %520 = vmatprep.subr.mxu1 %v42_v13 }
  0x38   :  { %454 = vmatpush3.msra.mxu0 %v42_v13  ;;  %536 = vmatpush3.msra.mxu1 %v42_v13 }
  0x39   :  { %455 = vmatprep.subr.mxu0 %v41_v14  ;;  %521 = vmatprep.subr.mxu1 %v41_v14 }
  0x3a   :  { %456 = vmatpush3.msra.mxu0 %v41_v14  ;;  %537 = vmatpush3.msra.mxu1 %v41_v14 }
  0x3b   :  { %457 = vmatprep.subr.mxu0 %v40_v15  ;;  %522 = vmatprep.subr.mxu1 %v40_v15 }
  0x3c   :  { %458 = vmatpush3.msra.mxu0 %v40_v15  ;;  %538 = vmatpush3.msra.mxu1 %v40_v15 }
  0x3d   :  { %459 = vmatprep.mubr.f32.mxu0 %v72_v16  ;;  %483 = vmatprep.mubr.f32.mxu1 %v88_v17 }
  0x3e   :  { %460 = vmatmul.mubr.f32.vlgmr.msra.gmra.mxu0 %v73_v18  ;;  %484 = vmatmul.mubr.f32.vlgmr.msra.gmra.mxu1 %v89_v19 }
  0x3f   :  { %462 = vmatprep.mubr.f32.mxu0 %v74_v20  ;;  %486 = vmatprep.mubr.f32.mxu1 %v90_v21 }
  0x42   :  { %463 = vmatmul.mubr.f32.gmra.mxu0 %v75_v22  ;;  %487 = vmatmul.mubr.f32.gmra.mxu1 %v91_v23 }
  0x43   :  { %465 = vmatprep.mubr.f32.mxu0 %v76_v24  ;;  %489 = vmatprep.mubr.f32.mxu1 %v92_v25 }
  0x46   :  { %466 = vmatmul.mubr.f32.gmra.mxu0 %v77_v26  ;;  %490 = vmatmul.mubr.f32.gmra.mxu1 %v93_v27 }
  0x47   :  { %468 = vmatprep.mubr.f32.mxu0 %v78_v28  ;;  %492 = vmatprep.mubr.f32.mxu1 %v94_v29 }
  0x4a   :  { %469 = vmatmul.mubr.f32.gmra.mxu0 %v79_v30  ;;  %493 = vmatmul.mubr.f32.gmra.mxu1 %v95_v31 }
  0x4b   :  { %471 = vmatprep.mubr.f32.mxu0 %v80_v32  ;;  %495 = vmatprep.mubr.f32.mxu1 %v96_v33 }
  0x4e   :  { %472 = vmatmul.mubr.f32.gmra.mxu0 %v81_v34  ;;  %496 = vmatmul.mubr.f32.gmra.mxu1 %v97_v35 }
  0x4f   :  { %474 = vmatprep.mubr.f32.mxu0 %v82_v36  ;;  %498 = vmatprep.mubr.f32.mxu1 %v98_v37 }
  0x52   :  { %475 = vmatmul.mubr.f32.gmra.mxu0 %v83_v38  ;;  %499 = vmatmul.mubr.f32.gmra.mxu1 %v99_v39 }
  0x53   :  { %477 = vmatprep.mubr.f32.mxu0 %v84_v40  ;;  %501 = vmatprep.mubr.f32.mxu1 %v100_v41 }
  0x56   :  { %478 = vmatmul.mubr.f32.gmra.mxu0 %v85_v42  ;;  %502 = vmatmul.mubr.f32.gmra.mxu1 %v101_v43 }
  0x57   :  { %480 = vmatprep.mubr.f32.mxu0 %v86_v44  ;;  %504 = vmatprep.mubr.f32.mxu1 %v102_v45 }
  0x5a   :  { %481 = vmatmul.mubr.f32.gmra.mxu0 %v87_v46  ;;  %505 = vmatmul.mubr.f32.gmra.mxu1 %v103_v47 }
  0xfe   :  { %v461_v48 = vpop.f32.mrf.mxu0  ;;  %v485_v49 = vpop.f32.mrf.mxu1 }
  0xff   :  { %330 = vst [vmem:[#allocation7 + $0x20] sm:$0xff] %v461_v48  ;;  %346 = vst [vmem:[#allocation7 + $0x28] sm:$0xff] %v485_v49 }
 0x100   :  { %v170_v50 = vpop.f32.mrf.mxu0  ;;  %v250_v51 = vpop.f32.mrf.mxu1 }
 0x101   :  { %329 = vst [vmem:[#allocation7 + $0x8] sm:$0xff] %v170_v50  ;;  %345 = vst [vmem:[#allocation7 + $0x10] sm:$0xff] %v250_v51 }
 0x102   :  { %v464_v52 = vpop.f32.mrf.mxu0  ;;  %v488_v53 = vpop.f32.mrf.mxu1 }
 0x103   :  { %332 = vst [vmem:[#allocation7 + $0x50] sm:$0xff] %v464_v52  ;;  %348 = vst [vmem:[#allocation7 + $0x58] sm:$0xff] %v488_v53 }
 0x104   :  { %v180_v54 = vpop.f32.mrf.mxu0  ;;  %v260_v55 = vpop.f32.mrf.mxu1 }
 0x105   :  { %331 = vst [vmem:[#allocation7 + $0x38] sm:$0xff] %v180_v54  ;;  %347 = vst [vmem:[#allocation7 + $0x40] sm:$0xff] %v260_v55 }
 0x106   :  { %v467_v56 = vpop.f32.mrf.mxu0  ;;  %v491_v57 = vpop.f32.mrf.mxu1 }
 0x107   :  { %334 = vst [vmem:[#allocation7 + $0x80] sm:$0xff] %v467_v56  ;;  %350 = vst [vmem:[#allocation7 + $0x88] sm:$0xff] %v491_v57 }
 0x108   :  { %v190_v58 = vpop.f32.mrf.mxu0  ;;  %v270_v59 = vpop.f32.mrf.mxu1 }
 0x109   :  { %333 = vst [vmem:[#allocation7 + $0x68] sm:$0xff] %v190_v58  ;;  %349 = vst [vmem:[#allocation7 + $0x70] sm:$0xff] %v270_v59 }
 0x10a   :  { %v470_v60 = vpop.f32.mrf.mxu0  ;;  %v494_v61 = vpop.f32.mrf.mxu1 }
 0x10b   :  { %336 = vst [vmem:[#allocation7 + $0xb0] sm:$0xff] %v470_v60  ;;  %352 = vst [vmem:[#allocation7 + $0xb8] sm:$0xff] %v494_v61 }
 0x10c   :  { %v200_v62 = vpop.f32.mrf.mxu0  ;;  %v280_v63 = vpop.f32.mrf.mxu1 }
 0x10d   :  { %335 = vst [vmem:[#allocation7 + $0x98] sm:$0xff] %v200_v62  ;;  %351 = vst [vmem:[#allocation7 + $0xa0] sm:$0xff] %v280_v63 }
 0x10e   :  { %v473_v0 = vpop.f32.mrf.mxu0  ;;  %v497_v1 = vpop.f32.mrf.mxu1 }
 0x10f   :  { %338 = vst [vmem:[#allocation7 + $0xe0] sm:$0xff] %v473_v0  ;;  %354 = vst [vmem:[#allocation7 + $0xe8] sm:$0xff] %v497_v1 }
 0x110   :  { %v210_v2 = vpop.f32.mrf.mxu0  ;;  %v290_v3 = vpop.f32.mrf.mxu1 }
 0x111   :  { %337 = vst [vmem:[#allocation7 + $0xc8] sm:$0xff] %v210_v2  ;;  %353 = vst [vmem:[#allocation7 + $0xd0] sm:$0xff] %v290_v3 }
 0x112   :  { %v476_v4 = vpop.f32.mrf.mxu0  ;;  %v500_v5 = vpop.f32.mrf.mxu1 }
 0x113   :  { %340 = vst [vmem:[#allocation7 + $0x110] sm:$0xff] %v476_v4  ;;  %356 = vst [vmem:[#allocation7 + $0x118] sm:$0xff] %v500_v5 }
 0x114   :  { %v220_v6 = vpop.f32.mrf.mxu0  ;;  %v300_v7 = vpop.f32.mrf.mxu1 }
 0x115   :  { %339 = vst [vmem:[#allocation7 + $0xf8] sm:$0xff] %v220_v6  ;;  %355 = vst [vmem:[#allocation7 + $0x100] sm:$0xff] %v300_v7 }
 0x116   :  { %v479_v8 = vpop.f32.mrf.mxu0  ;;  %v503_v9 = vpop.f32.mrf.mxu1 }
 0x117   :  { %342 = vst [vmem:[#allocation7 + $0x140] sm:$0xff] %v479_v8  ;;  %358 = vst [vmem:[#allocation7 + $0x148] sm:$0xff] %v503_v9 }
 0x118   :  { %v230_v10 = vpop.f32.mrf.mxu0  ;;  %v310_v11 = vpop.f32.mrf.mxu1 }
 0x119   :  { %341 = vst [vmem:[#allocation7 + $0x128] sm:$0xff] %v230_v10  ;;  %357 = vst [vmem:[#allocation7 + $0x130] sm:$0xff] %v310_v11 }
 0x11a   :  { %v482_v12 = vpop.f32.mrf.mxu0  ;;  %v506_v13 = vpop.f32.mrf.mxu1 }
 0x11b   :  { %344 = vst [vmem:[#allocation7 + $0x170] sm:$0xff] %v482_v12  ;;  %360 = vst [vmem:[#allocation7 + $0x178] sm:$0xff] %v506_v13 }
 0x11c   :  { %v240_v14 = vpop.f32.mrf.mxu0  ;;  %v320_v15 = vpop.f32.mrf.mxu1 }
 0x11d   :  { %343 = vst [vmem:[#allocation7 + $0x158] sm:$0xff] %v240_v14  ;;  %359 = vst [vmem:[#allocation7 + $0x160] sm:$0xff] %v320_v15 }
 0x11e   :  { %597 = shalt.err (!%p594_p0)
}
 0x11f   :  { %s617_s22 = smov 384   ;;  %s618_s23 = smov 24  }
 0x120   :  { %372 = dma.vmem_to_hbm [thread:$0]  %s367_s1, 6144, %s645_s2, [#allocation4], %s617_s22, %s617_s22, %s618_s23  }
 0x121   :  { %610 = dma.done.wait [#allocation4], 6144  }
 0x122   :  { %611 = vsyncadd [#allocation4], 4294961152 }
 0x123   :  { %376 = vsyncpa [#allocation3], 1 }
 0x124   :  { %377 = vsyncpa [#allocation6], 1 }
 0x125   :  { %378 = vsyncpa [#allocation4], 1 }

</bundles_post_ra>
